<compile_context>
chip_gen: v6e
topology: v6e:2x2x1
jax: 0.10.0
libtpu: 0.0.40
codegen_flags: <defaults>
</compile_context>

<pallas_src>
import functools

import jax
import jax.numpy as jnp
from jax.experimental import pallas as pl
from jax.experimental.pallas import tpu as pltpu


def actor_kernel(x_ref, w1_ref, b1_ref, wcat_ref, bcat_ref, out_ref, *, a1):
    # fc1 + leaky_relu(0.01)
    h = jnp.dot(x_ref[...], w1_ref[...], preferred_element_type=jnp.float32) + b1_ref[...]
    h = jnp.where(h > 0, h, 0.01 * h)

    # Fused fc2|fc3: one MXU matmul over the concatenated heads.
    logits = jnp.dot(h, wcat_ref[...], preferred_element_type=jnp.float32) + bcat_ref[...]

    # Two row-softmaxes in a single full-width masked pass: no misaligned lane
    # slices (which would force XLU relayouts), one exp, one store.
    lane = jax.lax.broadcasted_iota(jnp.int32, logits.shape, dimension=1)
    head1 = lane < a1
    neg_inf = jnp.float32(-jnp.inf)

    m1 = jnp.max(jnp.where(head1, logits, neg_inf), axis=1, keepdims=True)
    m2 = jnp.max(jnp.where(head1, neg_inf, logits), axis=1, keepdims=True)
    e = jnp.exp(logits - jnp.where(head1, m1, m2))

    s1 = jnp.sum(jnp.where(head1, e, 0.0), axis=1, keepdims=True)
    s2 = jnp.sum(jnp.where(head1, 0.0, e), axis=1, keepdims=True)
    r1 = pl.reciprocal(s1, approx=True)
    r1 = r1 * (2.0 - s1 * r1)          # one Newton refinement: ~f32 accuracy
    r2 = pl.reciprocal(s2, approx=True)
    r2 = r2 * (2.0 - s2 * r2)

    out_ref[...] = e * jnp.where(head1, r1, r2)


def _round_up(n, m):
    return ((n + m - 1) // m) * m


def actor_forward(x, params, *, tile_cap=8192, min_grid_steps=4):
    """x: (B, input_states) float32.  params: dict of (pre-transposed) weights & biases.

    Returns (action1, action2, action3) matching the PyTorch module.
    """
    x = x.astype(jnp.float32)
    B, D = x.shape
    w1, b1 = params["w1"], params["b1"]             # (D, 16),  (1, 16)
    w2, b2 = params["w2"], params["b2"]             # (16, A1), (1, A1)
    w3, b3 = params["w3"], params["b3"]             # (16, A2), (1, A2)
    A1, A2 = w2.shape[1], w3.shape[1]
    Acat = A1 + A2

    # Fuse fc2/fc3 params into a single lane-contiguous block.
    wcat = jnp.concatenate([w2, w3], axis=1)        # (16, A1+A2)
    bcat = jnp.concatenate([b2, b3], axis=1)        # (1,  A1+A2)

    # Adaptive batch tile: as big as possible (amortise per-step overhead), while
    # keeping >= min_grid_steps steps for large B so the "parallel" axis can shard
    # across v7x's two TensorCores.  Footprint at the cap (TB=8192): x tile 384 KiB,
    # out tile 256 KiB, double-buffered ~1.3 MiB total -> tiny on every generation.
    TB = min(tile_cap, max(8, _round_up(pl.cdiv(B, min_grid_steps), 8)))
    grid = (pl.cdiv(B, TB),)                        # partial tail block is masked by Pallas

    def resident(arr):                              # weights/biases stay VMEM-resident
        return pl.BlockSpec(arr.shape, lambda i: (0, 0))

    out = pl.pallas_call(
        functools.partial(actor_kernel, a1=A1),
        grid=grid,
        in_specs=[
            pl.BlockSpec((TB, D), lambda i: (i, 0)),
            resident(w1), resident(b1), resident(wcat), resident(bcat),
        ],
        out_specs=pl.BlockSpec((TB, Acat), lambda i: (i, 0)),
        out_shape=jax.ShapeDtypeStruct((B, Acat), jnp.float32),
        compiler_params=pltpu.CompilerParams(
            dimension_semantics=("parallel",),
        ),
    )(x, w1, b1, wcat, bcat)

    action1 = out[:, :A1]
    action2 = out[:, A1:]
    action3 = jnp.zeros((B, 1), jnp.float32)        # constant: no kernel store needed
    return action1, action2, action3


def init_actor_params(key, input_states, n_action_dim):
    """Deterministic init mimicking nn.Linear default (U[-1/sqrt(fan_in), 1/sqrt(fan_in)]).
    Weights stored as (in_features, out_features), i.e. already transposed."""
    hidden = 16
    a1, a2 = n_action_dim
    keys = jax.random.split(key, 6)

    def uni(k, shape, fan_in):
        bound = 1.0 / jnp.sqrt(jnp.float32(fan_in))
        return jax.random.uniform(k, shape, jnp.float32, -bound, bound)

    return {
        "w1": uni(keys[0], (input_states, hidden), input_states),
        "b1": uni(keys[1], (1, hidden), input_states),
        "w2": uni(keys[2], (hidden, a1), hidden),
        "b2": uni(keys[3], (1, a1), hidden),
        "w3": uni(keys[4], (hidden, a2), hidden),
        "b3": uni(keys[5], (1, a2), hidden),
    }


def actor_reference(x, params):
    """Pure-JAX reference for validation (HIGHEST precision so the reference matmuls
    are true f32, matching the kernel's f32 compute)."""
    hp = jax.lax.Precision.HIGHEST
    h = jnp.dot(x, params["w1"], precision=hp) + params["b1"]
    h = jnp.where(h > 0, h, 0.01 * h)
    a1 = jax.nn.softmax(jnp.dot(h, params["w2"], precision=hp) + params["b2"], axis=1)
    a2 = jax.nn.softmax(jnp.dot(h, params["w3"], precision=hp) + params["b3"], axis=1)
    a3 = jnp.zeros((x.shape[0], 1), jnp.float32)
    return a1, a2, a3


def _check(x, params, n_action_dim, atol=5e-5, tag=""):
    a1, a2, a3 = actor_forward(x, params)
    jax.block_until_ready((a1, a2, a3))
    r1, r2, r3 = actor_reference(x, params)
    B = x.shape[0]
    assert a1.shape == (B, n_action_dim[0]), f"action1 shape {tag}"
    assert a2.shape == (B, n_action_dim[1]), f"action2 shape {tag}"
    assert a3.shape == (B, 1), f"action3 shape {tag}"
    assert jnp.allclose(a1, r1, atol=atol), f"action1 mismatch {tag}"
    assert jnp.allclose(a2, r2, atol=atol), f"action2 mismatch {tag}"
    assert jnp.allclose(a3, r3), f"action3 mismatch {tag}"


if __name__ == "__main__":
    key = jax.random.PRNGKey(0)
    k_param, k_x, k_x2, k_x3 = jax.random.split(key, 4)

    input_states = 12
    n_action_dim = (5, 3)
    params = init_actor_params(k_param, input_states, n_action_dim)

    # Small batch (single grid step).
    x = jax.random.normal(k_x, (8, input_states), jnp.float32)
    _check(x, params, n_action_dim, tag="(B=8)")

    # Larger batch, not a multiple of the tile (partial-tail block, multi-step grid).
    x2 = jax.random.normal(k_x2, (1000, input_states), jnp.float32)
    _check(x2, params, n_action_dim, tag="(B=1000)")

    # Batch not a multiple of 8 (exercises masked tail rows directly).
    x3 = jax.random.normal(k_x3, (13, input_states), jnp.float32)
    _check(x3, params, n_action_dim, tag="(B=13)")

    print("KERNEL_OK")
</pallas_src>

<mosaic_0001>
module attributes {stable_mosaic.version = 11 : i64} {
  func.func @actor_kernel(%arg0: i32, %arg1: memref<8x12xf32, #tpu.memory_space<vmem>>, %arg2: memref<12x16xf32, #tpu.memory_space<vmem>>, %arg3: memref<1x16xf32, #tpu.memory_space<vmem>>, %arg4: memref<16x8xf32, #tpu.memory_space<vmem>>, %arg5: memref<1x8xf32, #tpu.memory_space<vmem>>, %arg6: memref<8x8xf32, #tpu.memory_space<vmem>>) attributes {dimension_semantics = [#tpu.dimension_semantics<parallel>], iteration_bounds = array<i64: 1>, scalar_prefetch = 0 : i64, scratch_operands = 0 : i64, tpu.core_type = #tpu.core_type<tc>, window_params = [{transform_indices = @transform_0, window_bounds = array<i64: 8, 12>}, {pipeline_mode = #tpu.pipeline_mode<synchronous>, transform_indices = @transform_1, window_bounds = array<i64: 12, 16>}, {pipeline_mode = #tpu.pipeline_mode<synchronous>, transform_indices = @transform_2, window_bounds = array<i64: 1, 16>}, {pipeline_mode = #tpu.pipeline_mode<synchronous>, transform_indices = @transform_3, window_bounds = array<i64: 16, 8>}, {pipeline_mode = #tpu.pipeline_mode<synchronous>, transform_indices = @transform_4, window_bounds = array<i64: 1, 8>}, {transform_indices = @transform_5, window_bounds = array<i64: 8, 8>}]} {
    %c0 = arith.constant 0 : index
    %c0_0 = arith.constant 0 : index
    %0 = vector.load %arg1[%c0, %c0_0] : memref<8x12xf32, #tpu.memory_space<vmem>>, vector<8x12xf32>
    %c0_1 = arith.constant 0 : index
    %c0_2 = arith.constant 0 : index
    %1 = vector.load %arg2[%c0_1, %c0_2] : memref<12x16xf32, #tpu.memory_space<vmem>>, vector<12x16xf32>
    %cst = arith.constant dense<0.000000e+00> : vector<8x16xf32>
    %2 = tpu.matmul %0, %1, %cst {dimension_numbers = #tpu.dot_dimension_numbers<[1], [0], [0], [1], [0, 0, 1, 1], [], []>} : vector<8x12xf32>, vector<12x16xf32>, vector<8x16xf32> -> vector<8x16xf32>
    %c0_3 = arith.constant 0 : index
    %c0_4 = arith.constant 0 : index
    %3 = vector.load %arg3[%c0_3, %c0_4] : memref<1x16xf32, #tpu.memory_space<vmem>>, vector<1x16xf32>
    %4 = vector.broadcast %3 : vector<1x16xf32> to vector<8x16xf32>
    %5 = arith.addf %2, %4 : vector<8x16xf32>
    %cst_5 = arith.constant 0.000000e+00 : f32
    %6 = vector.broadcast %cst_5 : f32 to vector<8x16xf32>
    %7 = arith.cmpf ogt, %5, %6 : vector<8x16xf32>
    %cst_6 = arith.constant 0.00999999977 : f32
    %8 = vector.broadcast %cst_6 : f32 to vector<8x16xf32>
    %9 = arith.mulf %8, %5 : vector<8x16xf32>
    %10 = arith.select %7, %5, %9 : vector<8x16xi1>, vector<8x16xf32>
    %c0_7 = arith.constant 0 : index
    %c0_8 = arith.constant 0 : index
    %11 = vector.load %arg4[%c0_7, %c0_8] : memref<16x8xf32, #tpu.memory_space<vmem>>, vector<16x8xf32>
    %cst_9 = arith.constant dense<0.000000e+00> : vector<8x8xf32>
    %12 = tpu.matmul %10, %11, %cst_9 {dimension_numbers = #tpu.dot_dimension_numbers<[1], [0], [0], [1], [0, 0, 1, 1], [], []>} : vector<8x16xf32>, vector<16x8xf32>, vector<8x8xf32> -> vector<8x8xf32>
    %c0_10 = arith.constant 0 : index
    %c0_11 = arith.constant 0 : index
    %13 = vector.load %arg5[%c0_10, %c0_11] : memref<1x8xf32, #tpu.memory_space<vmem>>, vector<1x8xf32>
    %14 = vector.broadcast %13 : vector<1x8xf32> to vector<8x8xf32>
    %15 = arith.addf %12, %14 : vector<8x8xf32>
    %16 = tpu.iota {dimensions = array<i32: 1>} : vector<8x8xi32>
    %c5_i32 = arith.constant 5 : i32
    %17 = vector.broadcast %c5_i32 : i32 to vector<8x8xi32>
    %18 = arith.cmpi slt, %16, %17 : vector<8x8xi32>
    %cst_12 = arith.constant 0xFF800000 : f32
    %19 = vector.broadcast %cst_12 : f32 to vector<8x8xf32>
    %20 = arith.select %18, %15, %19 : vector<8x8xi1>, vector<8x8xf32>
    %cst_13 = arith.constant dense<0xFF800000> : vector<8xf32>
    %21 = vector.multi_reduction <maximumf>, %20, %cst_13 [1] : vector<8x8xf32> to vector<8xf32>
    %22 = vector.shape_cast %21 : vector<8xf32> to vector<8x1xf32>
    %cst_14 = arith.constant 0xFF800000 : f32
    %23 = vector.broadcast %cst_14 : f32 to vector<8x8xf32>
    %24 = arith.select %18, %23, %15 : vector<8x8xi1>, vector<8x8xf32>
    %cst_15 = arith.constant dense<0xFF800000> : vector<8xf32>
    %25 = vector.multi_reduction <maximumf>, %24, %cst_15 [1] : vector<8x8xf32> to vector<8xf32>
    %26 = vector.shape_cast %25 : vector<8xf32> to vector<8x1xf32>
    %27 = vector.shape_cast %22 : vector<8x1xf32> to vector<8x1xf32>
    %28 = vector.broadcast %27 : vector<8x1xf32> to vector<8x8xf32>
    %29 = vector.shape_cast %26 : vector<8x1xf32> to vector<8x1xf32>
    %30 = vector.broadcast %29 : vector<8x1xf32> to vector<8x8xf32>
    %31 = arith.select %18, %28, %30 : vector<8x8xi1>, vector<8x8xf32>
    %32 = arith.subf %15, %31 : vector<8x8xf32>
    %33 = math.exp %32 : vector<8x8xf32>
    %cst_16 = arith.constant 0.000000e+00 : f32
    %34 = vector.broadcast %cst_16 : f32 to vector<8x8xf32>
    %35 = arith.select %18, %33, %34 : vector<8x8xi1>, vector<8x8xf32>
    %cst_17 = arith.constant dense<0.000000e+00> : vector<8xf32>
    %36 = vector.multi_reduction <add>, %35, %cst_17 [1] : vector<8x8xf32> to vector<8xf32>
    %37 = vector.shape_cast %36 : vector<8xf32> to vector<8x1xf32>
    %cst_18 = arith.constant 0.000000e+00 : f32
    %38 = vector.broadcast %cst_18 : f32 to vector<8x8xf32>
    %39 = arith.select %18, %38, %33 : vector<8x8xi1>, vector<8x8xf32>
    %cst_19 = arith.constant dense<0.000000e+00> : vector<8xf32>
    %40 = vector.multi_reduction <add>, %39, %cst_19 [1] : vector<8x8xf32> to vector<8xf32>
    %41 = vector.shape_cast %40 : vector<8xf32> to vector<8x1xf32>
    %42 = tpu.reciprocal %37 {approx = true} : vector<8x1xf32> -> vector<8x1xf32>
    %43 = arith.mulf %37, %42 : vector<8x1xf32>
    %cst_20 = arith.constant 2.000000e+00 : f32
    %44 = vector.broadcast %cst_20 : f32 to vector<8x1xf32>
    %45 = arith.subf %44, %43 : vector<8x1xf32>
    %46 = arith.mulf %42, %45 : vector<8x1xf32>
    %47 = tpu.reciprocal %41 {approx = true} : vector<8x1xf32> -> vector<8x1xf32>
    %48 = arith.mulf %41, %47 : vector<8x1xf32>
    %cst_21 = arith.constant 2.000000e+00 : f32
    %49 = vector.broadcast %cst_21 : f32 to vector<8x1xf32>
    %50 = arith.subf %49, %48 : vector<8x1xf32>
    %51 = arith.mulf %47, %50 : vector<8x1xf32>
    %52 = vector.shape_cast %46 : vector<8x1xf32> to vector<8x1xf32>
    %53 = vector.broadcast %52 : vector<8x1xf32> to vector<8x8xf32>
    %54 = vector.shape_cast %51 : vector<8x1xf32> to vector<8x1xf32>
    %55 = vector.broadcast %54 : vector<8x1xf32> to vector<8x8xf32>
    %56 = arith.select %18, %53, %55 : vector<8x8xi1>, vector<8x8xf32>
    %57 = arith.mulf %33, %56 : vector<8x8xf32>
    %c0_22 = arith.constant 0 : index
    %c0_23 = arith.constant 0 : index
    %58 = vector.load %arg6[%c0_22, %c0_23] : memref<8x8xf32, #tpu.memory_space<vmem>>, vector<8x8xf32>
    tpu.vector_store %arg6[%c0_22, %c0_23], %57 {strides = array<i32>} : memref<8x8xf32, #tpu.memory_space<vmem>>, vector<8x8xf32>,
    return
  }
  func.func @transform_0(%arg0: i32) -> (i32, i32) {
    %c0_i32 = arith.constant 0 : i32
    %c0_i32_0 = arith.constant 0 : i32
    return %arg0, %c0_i32 : i32, i32
  }
  func.func @transform_1(%arg0: i32) -> (i32, i32) {
    %c0_i32 = arith.constant 0 : i32
    %c0_i32_0 = arith.constant 0 : i32
    %c0_i32_1 = arith.constant 0 : i32
    return %c0_i32, %c0_i32_0 : i32, i32
  }
  func.func @transform_2(%arg0: i32) -> (i32, i32) {
    %c0_i32 = arith.constant 0 : i32
    %c0_i32_0 = arith.constant 0 : i32
    %c0_i32_1 = arith.constant 0 : i32
    return %c0_i32, %c0_i32_0 : i32, i32
  }
  func.func @transform_3(%arg0: i32) -> (i32, i32) {
    %c0_i32 = arith.constant 0 : i32
    %c0_i32_0 = arith.constant 0 : i32
    %c0_i32_1 = arith.constant 0 : i32
    return %c0_i32, %c0_i32_0 : i32, i32
  }
  func.func @transform_4(%arg0: i32) -> (i32, i32) {
    %c0_i32 = arith.constant 0 : i32
    %c0_i32_0 = arith.constant 0 : i32
    %c0_i32_1 = arith.constant 0 : i32
    return %c0_i32, %c0_i32_0 : i32, i32
  }
  func.func @transform_5(%arg0: i32) -> (i32, i32) {
    %c0_i32 = arith.constant 0 : i32
    %c0_i32_0 = arith.constant 0 : i32
    return %arg0, %c0_i32 : i32, i32
  }
}

</mosaic_0001>

<bundles_post_ra>
// kernel: tpu_custom_call.1
= control target key start
LH: loop header
LB: loop body
LE: loop exit
PB: predicated region body
PF: predicated region fallthrough
CT: control target
= control target key end

     0   :  { %vm35_vm0 = vcmask 1043456   ;;  %v300_v1 = vmov 0.0   ;;  %vm301_vm1 = vmmov 0   ;;  %s368_s0 = inlined_call_operand.vmem [shape: f32[8,12], index: 0, kind: input, shape index: {}]   ;;  %s369_s1 = inlined_call_operand.vmem [shape: f32[12,16], index: 1, kind: input, shape index: {}]   ;;  %s370_s2 = inlined_call_operand.vmem [shape: f32[1,16], index: 2, kind: input, shape index: {}]   ;;  %s371_s3 = inlined_call_operand.vmem [shape: f32[16,8], index: 3, kind: input, shape index: {}]   ;;  %s372_s4 = inlined_call_operand.vmem [shape: f32[1,8], index: 4, kind: input, shape index: {}]   ;;  %s373_s5 = inlined_call_operand.hbm [shape: f32[8,8], index: 5, kind: output, shape index: {}]  }
   0x1   :  { %v23_v0 = vld [vmem:[%s369_s1 + $0x8] sm:$0xf]  ;;  %255 = vmatprep.subr.mxu0 %v300_v1  ;;  %v22_v2 = vld [vmem:[%s369_s1] sm:$0xff]  ;;  %259 = vmatprep.mubr.msk.f32.mxu0 %vm301_vm1, %v300_v1 }
   0x2   :  { %10 = vsyncpa [#allocation3], 0  ;;  %256 = vmatpush3.msk.msra.mxu0 %vm35_vm0, %v23_v0  ;;  %v21_v3 = vld [vmem:[%s368_s0] sm:$0xff]  ;;  %vm31_vm2 = vcmask 97280   ;;  %262 = vmatprep.subr.mxu1 %v300_v1  ;;  %v113_v4 = vld [vmem:[%s371_s3 + $0x8] sm:$0xff]  ;;  %vm121_vm4 = vcmask 130048   ;;  %v195_v12 = vlaneseq }
   0x3   :  { %257 = vmatprep.subr.mxu0 %v300_v1  ;;  %266 = vmatprep.mubr.msk.f32.mxu1 %vm301_vm1, %v300_v1  ;;  %v112_v5 = vld [vmem:[%s371_s3] sm:$0xff]  ;;  %vm199_vm6 = vcmask 64512  }
   0x4   :  { %258 = vmatpush3.msra.mxu0 %v22_v2  ;;  %263 = vmatpush3.msra.mxu1 %v113_v4  ;;  %v244_v6 = vld [vmem:[%s370_s2] ss:$0 sm:$0xff]  ;;  %v196_v13 = vand.u32 127, %v195_v12  ;;  %s302_s2 = smov [#allocation2]  }
   0x5   :  { %260 = vmatmul.mubr.msk.f32.vlgmr.msra.gmra.mxu0 %vm31_vm2, %v21_v3  ;;  %264 = vmatprep.subr.mxu1 %v300_v1  ;;  %v247_v14 = vld [vmem:[%s372_s4] ss:$0 sm:$0xff]  ;;  %s236_s3 = sshll.u32 %s302_s2, 4  ;;  %s237_s3 = int_to_ptr.vmem [resolvable:$true] %s236_s3 }
   0x6   :  { %265 = vmatpush3.msra.mxu1 %v112_v5  ;;  %vm197_vm5 = vcmp.lt.s32.totalorder %v196_v13, 5  ;;  %s278_s4 = scalar_lea.vmem %s237_s3, 128  ;;  %p283_p1 = scmp.lt.s32.totalorder %s237_s3, %s237_s3 }
   0x7   :  { %p279_p0 = scmp.ne.s32.totalorder %s237_s3, %s278_s4  ;;  %p284_p2 = scmp.lt.s32.totalorder %s278_s4, %s278_s4 }
   0x9   :  { %p285_p3 = por %p284_p2, %p283_p1 }
   0xb   :  { %p286_p4 = pnand %p285_p3, %p279_p0 }
  0xc5   :  { %v105_v7 = vpop.f32.mrf.mxu0 }
  0xc6   :  { %v106_v8 = vadd.f32 %v244_v6, %v105_v7 }
  0xc7   :  { %v261_v9 = vpop.f32.mrf.mxu0 }
  0xc8   :  { %vm109_vm3 = vcmp.gt.f32.partialorder %v106_v8, 0.0  ;;  %v110_v10 = vmul.f32 0.01, %v106_v8 }
  0xca   :  { %v111_v11 = vsel %vm109_vm3, %v106_v8, %v110_v10 }
  0xcb   :  { %267 = vmatmul.mubr.msk.f32.vlgmr.msra.gmra.mxu1 %vm121_vm4, %v111_v11 }
 0x18b   :  { %v191_v15 = vpop.f32.mrf.mxu1 }
 0x18c   :  { %v192_v16 = vadd.f32 %v247_v14, %v191_v15 }
 0x18d   :  { %v268_v17 = vpop.f32.mrf.mxu1 }
 0x18e   :  { %v198_v18 = vsel %vm197_vm5, %v192_v16, -inf  ;;  %v203_v20 = vsel %vm197_vm5, -inf, %v192_v16 }
 0x18f   :  { %v200_v19 = vsel %vm199_vm6, %v198_v18, -inf  ;;  %v204_v21 = vsel %vm199_vm6, %v203_v20, -inf }
 0x190   :  { %201 = vmax.xlane.f32.xlu0 %v200_v19 }
 0x194   :  { %205 = vmax.xlane.f32.xlu0 %v204_v21 }
 0x219   :  { %v202_v22 = vpop.xlane.xlu0 %201 }
 0x21d   :  { %v206_v23 = vpop.xlane.xlu0 %205 }
 0x21e   :  { %v207_v24 = vsel %vm197_vm5, %v202_v22, %v206_v23 }
 0x21f   :  { %v208_v25 = vsub.f32 %v192_v16, %v207_v24 }
 0x221   :  { %v209_v26 = vmul.f32 1.442695, %v208_v25 }
 0x223   :  { %272 = vpow2.f32 %v209_v26 }
 0x230   :  { %v273_v27 = vpop.eup %272 }
 0x231   :  { %v211_v28 = vsel %vm197_vm5, %v273_v27, 0.0  ;;  %v215_v30 = vsel %vm197_vm5, 0.0, %v273_v27 }
 0x232   :  { %v212_v29 = vsel %vm199_vm6, %v211_v28, 0.0  ;;  %v216_v31 = vsel %vm199_vm6, %v215_v30, 0.0 }
 0x233   :  { %213 = vadd.xlane.f32.xlu1 %v212_v29 }
 0x237   :  { %217 = vadd.xlane.f32.xlu1 %v216_v31 }
 0x2bc   :  { %v214_v32 = vpop.xlane.xlu1 %213 }
 0x2bd   :  { %274 = vrcp.f32 %v214_v32 }
 0x2c0   :  { %v218_v33 = vpop.xlane.xlu1 %217 }
 0x2c1   :  { %276 = vrcp.f32 %v218_v33 }
 0x2ca   :  { %v275_v34 = vpop.eup %274 }
 0x2cb   :  { %v220_v35 = vmul.f32 %v275_v34, %v214_v32 }
 0x2cd   :  { %v221_v37 = vsub.f32 2.0, %v220_v35 }
 0x2ce   :  { %v277_v36 = vpop.eup %276 }
 0x2cf   :  { %v224_v38 = vmul.f32 %v277_v36, %v218_v33  ;;  %v222_v40 = vmul.f32 %v275_v34, %v221_v37 }
 0x2d1   :  { %v225_v39 = vsub.f32 2.0, %v224_v38 }
 0x2d3   :  { %v226_v41 = vmul.f32 %v277_v36, %v225_v39 }
 0x2d5   :  { %v227_v42 = vsel %vm197_vm5, %v222_v40, %v226_v41 }
 0x2d6   :  { %v228_v43 = vmul.f32 %v273_v27, %v227_v42 }
 0x2d8   :  { %229 = vst.msk [vmem:[#allocation2] sm:$0xff] %vm199_vm6, %v228_v43 }
 0x2d9   :  { %289 = shalt.err (!%p286_p4)
}
 0x2da   :  { %239 = dma.vmem_to_hbm [thread:$0]  %s237_s3, 128, %s373_s5, [#allocation3]  }
 0x2db   :  { %298 = dma.done.wait [#allocation3], 128  }
 0x2dc   :  { %299 = vsyncadd [#allocation3], 4294967168 }
 0x2dd   :  { %243 = vsyncpa [#allocation3], 1 }

</bundles_post_ra>
